<compile_context>
chip_gen: v5e
topology: v5e:2x2
jax: 0.10.0
libtpu: 0.0.40
codegen_flags: <defaults>
</compile_context>

<pallas_src>
import functools
import math

import jax
import jax.numpy as jnp
from jax.experimental import pallas as pl
from jax.experimental.pallas import tpu as pltpu


def _policy_rsnn_kernel(dcy_syn, dcy_mem, scl_mem,
                        x_ref, wx_ref, wo_ref, b_ref, o_ref, state_ref):
    TB, NT, D = x_ref.shape
    A = o_ref.shape[2]
    C = wo_ref.shape[1]          # C = 2*H + A (lane-concatenated state width)
    H2 = C - A                   # spiking (hidden) columns

    @pl.when(pl.program_id(1) == 0)
    def _init_state():
        # basis.reset_state(batch_size): all neuron state starts at zero.
        state_ref[...] = jnp.zeros_like(state_ref)

    # ---- per-block input projection: one MXU pass for all TB steps ----------
    # (TB, NT, D) -> (TB*NT, D): NT is a multiple of 8, so this collapse is a
    # pure re-labelling of sublane tiles (no data movement).
    x2d = x_ref[...].reshape(TB * NT, D)
    xp = (jnp.dot(x2d, wx_ref[...], preferred_element_type=jnp.float32)
          + b_ref[...]).reshape(TB, NT, C)     # bias broadcast hoisted out of loop

    wo = wo_ref[...]                           # hoist weight load out of the loop
    # Spike / subtractive-reset mask: 1 for hidden columns, 0 for readout pool.
    hidden_col = jax.lax.broadcasted_iota(jnp.int32, (NT, C), 1) < H2

    syn = state_ref[0]
    mem = state_ref[1]

    # Fully unrolled time loop (TB is small; tiny live ranges) -> static
    # indices, lets the scheduler interleave the per-step matmul with the VPU
    # state update.
    for tt in range(TB):
        # SigmoidSpike forward = Heaviside(mem - 1); readout columns never spike.
        spk = jnp.logical_and(mem > 1.0, hidden_col).astype(jnp.float32)
        # Fused recurrent input: [0 | i2 | i3] from previous-step spikes
        # (Wo rows for the readout columns are zero, so masked spikes are inert).
        z = xp[tt] + jnp.dot(spk, wo, preferred_element_type=jnp.float32)
        new_mem = dcy_mem * mem + scl_mem * syn - spk      # sub reset (masked)
        syn = dcy_syn * syn + z
        mem = new_mem
        # DirectReadoutGroup (n_readouts=1 -> identity) + tanh, out_style='last'.
        o_ref[tt] = jnp.tanh(mem[:, H2:])

    state_ref[0] = syn
    state_ref[1] = mem


def _round_up(x, m):
    return ((x + m - 1) // m) * m


def make_params(key, state_dim, target_dim, hidden_dim, action_dim,
                nu=50.0, tau_syn=2e-3):
    """Deterministic synthetic init mimicking FluctuationDrivenCenteredNormalInitializer."""
    input_dim = state_dim + target_dim
    k1, k2, k3 = jax.random.split(key, 3)

    def w_init(k, fan_out, fan_in):
        sigma = 1.0 / math.sqrt(fan_in * nu * tau_syn)
        return sigma * jax.random.normal(k, (fan_out, fan_in), dtype=jnp.float32)

    # The DirectReadoutGroup connection (AverageInitializer, bias=False,
    # requires_grad=False) is the identity for n_readouts=1 and is folded away
    # entirely (no W4 here and no matmul in the kernel).
    return {
        "W1": w_init(k1, hidden_dim, input_dim),
        "b1": jnp.zeros((1, hidden_dim), jnp.float32),
        "W2": w_init(k2, hidden_dim, hidden_dim),
        "b2": jnp.zeros((1, hidden_dim), jnp.float32),
        "W3": w_init(k3, action_dim, hidden_dim),
        "b3": jnp.zeros((1, action_dim), jnp.float32),
    }


def policy_net_forward(state, target, params,
                       dt=1e-3, tau_mem=5e-3, tau_syn=2e-3,
                       time_block=8, batch_block=None):
    x = jnp.concatenate([state, target], axis=-1).astype(jnp.float32)  # (T,N,D)
    T, N, D = x.shape
    H = params["W1"].shape[0]
    A = params["W3"].shape[0]
    C = 2 * H + A   # concatenated neuron-state width: [LIF1 | LIF2 | readout]

    dcy_syn = math.exp(-dt / tau_syn)
    dcy_mem = math.exp(-dt / tau_mem)
    scl_mem = 1.0 - dcy_mem

    # ---- fused block-structured weights (built once, outside the kernel) ----
    #   xp = x @ Wx + b      contributes [ i1 | b2 | b3 ] columns,
    #   z  = xp + spk @ Wo   adds        [  0 | i2 | i3 ] from previous spikes.
    wx = jnp.zeros((D, C), jnp.float32).at[:, :H].set(params["W1"].T)
    wo = (jnp.zeros((C, C), jnp.float32)
          .at[:H, H:2 * H].set(params["W2"].T)
          .at[H:2 * H, 2 * H:].set(params["W3"].T))
    b = jnp.concatenate([params["b1"], params["b2"], params["b3"]], axis=-1)

    # ---- padding: sublane-aligned batch tiles, whole time blocks ------------
    TB = max(1, int(time_block))
    if batch_block is None:
        NT = _round_up(N, 8)
    else:
        NT = _round_up(int(batch_block), 8)
    N_pad = _round_up(max(N, NT), NT)
    T_pad = _round_up(T, TB)
    x_pad = jnp.pad(x, ((0, T_pad - T), (0, N_pad - N), (0, 0)))

    grid = (N_pad // NT, T_pad // TB)  # (batch tiles [parallel], time blocks [sequential])

    kernel = functools.partial(_policy_rsnn_kernel, dcy_syn, dcy_mem, scl_mem)

    grid_spec = pltpu.PrefetchScalarGridSpec(
        num_scalar_prefetch=0,
        grid=grid,
        in_specs=[
            pl.BlockSpec((TB, NT, D), lambda nb, tb: (tb, nb, 0)),   # x time/batch block
            # Constant-index weight blocks: Pallas keeps the resident copy
            # across grid steps (index_map never changes), so the ~20 KiB of
            # weights are fetched once per batch tile.
            pl.BlockSpec((D, C), lambda nb, tb: (0, 0)),             # Wx
            pl.BlockSpec((C, C), lambda nb, tb: (0, 0)),             # Wo
            pl.BlockSpec((1, C), lambda nb, tb: (0, 0)),             # fused bias row
        ],
        out_specs=pl.BlockSpec((TB, NT, A), lambda nb, tb: (tb, nb, 0)),
        scratch_shapes=[
            pltpu.VMEM((2, NT, C), jnp.float32),  # [syn; mem], carried across time blocks
        ],
    )

    out = pl.pallas_call(
        kernel,
        out_shape=jax.ShapeDtypeStruct((T_pad, N_pad, A), jnp.float32),
        grid_spec=grid_spec,
        compiler_params=pltpu.CompilerParams(
            # batch tiles are independent -> "parallel" (megacore on v7x);
            # time blocks carry neuron state -> "arbitrary" (sequential).
            dimension_semantics=("parallel", "arbitrary"),
        ),
    )(x_pad, wx, wo, b)

    return out[:T, :N]


if __name__ == "__main__":
    key = jax.random.PRNGKey(0)
    kp, ks, kt = jax.random.split(key, 3)

    T, N = 32, 16
    state_dim, target_dim, hidden_dim, action_dim = 12, 4, 32, 4

    params = make_params(kp, state_dim, target_dim, hidden_dim, action_dim)
    state = jax.random.normal(ks, (T, N, state_dim), dtype=jnp.float32)
    target = jax.random.normal(kt, (T, N, target_dim), dtype=jnp.float32)

    mu_outs = policy_net_forward(state, target, params,
                                 time_block=8, batch_block=8)
    jax.block_until_ready(mu_outs)

    assert mu_outs.shape == (T, N, action_dim)
    assert bool(jnp.all(jnp.isfinite(mu_outs)))
    assert bool(jnp.all(jnp.abs(mu_outs) <= 1.0))  # tanh output range
    print("KERNEL_OK")
</pallas_src>

<mosaic_0001>
module attributes {stable_mosaic.version = 11 : i64} {
  func.func @_policy_rsnn_kernel(%arg0: i32, %arg1: i32, %arg2: memref<8x8x16xf32, #tpu.memory_space<vmem>>, %arg3: memref<16x68xf32, #tpu.memory_space<vmem>>, %arg4: memref<68x68xf32, #tpu.memory_space<vmem>>, %arg5: memref<1x68xf32, #tpu.memory_space<vmem>>, %arg6: memref<8x8x4xf32, #tpu.memory_space<vmem>>, %arg7: memref<2x8x68xf32, #tpu.memory_space<vmem>>) attributes {dimension_semantics = [#tpu.dimension_semantics<parallel>, #tpu.dimension_semantics<arbitrary>], iteration_bounds = array<i64: 2, 4>, scalar_prefetch = 0 : i64, scratch_operands = 1 : i64, tpu.core_type = #tpu.core_type<tc>, window_params = [{transform_indices = @transform_0, window_bounds = array<i64: 8, 8, 16>}, {pipeline_mode = #tpu.pipeline_mode<synchronous>, transform_indices = @transform_1, window_bounds = array<i64: 16, 68>}, {pipeline_mode = #tpu.pipeline_mode<synchronous>, transform_indices = @transform_2, window_bounds = array<i64: 68, 68>}, {pipeline_mode = #tpu.pipeline_mode<synchronous>, transform_indices = @transform_3, window_bounds = array<i64: 1, 68>}, {transform_indices = @transform_4, window_bounds = array<i64: 8, 8, 4>}]} {
    %c0_i32 = arith.constant 0 : i32
    %0 = arith.cmpi eq, %arg1, %c0_i32 : i32
    %1 = arith.extui %0 : i1 to i32
    %c0_i32_0 = arith.constant 0 : i32
    %2 = arith.cmpi ne, %1, %c0_i32_0 : i32
    scf.if %2 {
      %cst_78 = arith.constant 0.000000e+00 : f32
      %209 = vector.broadcast %cst_78 : f32 to vector<2x8x68xf32>
      %c0_79 = arith.constant 0 : index
      %c0_80 = arith.constant 0 : index
      %c0_81 = arith.constant 0 : index
      %210 = vector.load %arg7[%c0_79, %c0_80, %c0_81] : memref<2x8x68xf32, #tpu.memory_space<vmem>>, vector<2x8x68xf32>
      tpu.vector_store %arg7[%c0_79, %c0_80, %c0_81], %209 {strides = array<i32>} : memref<2x8x68xf32, #tpu.memory_space<vmem>>, vector<2x8x68xf32>,
    } else {
    }
    %c0 = arith.constant 0 : index
    %c0_1 = arith.constant 0 : index
    %c0_2 = arith.constant 0 : index
    %3 = vector.load %arg2[%c0, %c0_1, %c0_2] : memref<8x8x16xf32, #tpu.memory_space<vmem>>, vector<8x8x16xf32>
    %4 = vector.shape_cast %3 : vector<8x8x16xf32> to vector<64x16xf32>
    %c0_3 = arith.constant 0 : index
    %c0_4 = arith.constant 0 : index
    %5 = vector.load %arg3[%c0_3, %c0_4] : memref<16x68xf32, #tpu.memory_space<vmem>>, vector<16x68xf32>
    %cst = arith.constant dense<0.000000e+00> : vector<64x68xf32>
    %6 = tpu.matmul %4, %5, %cst {dimension_numbers = #tpu.dot_dimension_numbers<[1], [0], [0], [1], [0, 0, 1, 1], [], []>} : vector<64x16xf32>, vector<16x68xf32>, vector<64x68xf32> -> vector<64x68xf32>
    %c0_5 = arith.constant 0 : index
    %c0_6 = arith.constant 0 : index
    %7 = vector.load %arg5[%c0_5, %c0_6] : memref<1x68xf32, #tpu.memory_space<vmem>>, vector<1x68xf32>
    %8 = vector.broadcast %7 : vector<1x68xf32> to vector<64x68xf32>
    %9 = arith.addf %6, %8 : vector<64x68xf32>
    %10 = vector.shape_cast %9 : vector<64x68xf32> to vector<8x8x68xf32>
    %c0_7 = arith.constant 0 : index
    %c0_8 = arith.constant 0 : index
    %11 = vector.load %arg4[%c0_7, %c0_8] : memref<68x68xf32, #tpu.memory_space<vmem>>, vector<68x68xf32>
    %12 = tpu.iota {dimensions = array<i32: 1>} : vector<8x68xi32>
    %c64_i32 = arith.constant 64 : i32
    %13 = vector.broadcast %c64_i32 : i32 to vector<8x68xi32>
    %14 = arith.cmpi slt, %12, %13 : vector<8x68xi32>
    %c0_9 = arith.constant 0 : index
    %c0_10 = arith.constant 0 : index
    %c0_11 = arith.constant 0 : index
    %15 = vector.load %arg7[%c0_9, %c0_10, %c0_11] : memref<2x8x68xf32, #tpu.memory_space<vmem>>, vector<1x8x68xf32>
    %16 = vector.shape_cast %15 : vector<1x8x68xf32> to vector<8x68xf32>
    %c1 = arith.constant 1 : index
    %c0_12 = arith.constant 0 : index
    %c0_13 = arith.constant 0 : index
    %17 = vector.load %arg7[%c1, %c0_12, %c0_13] : memref<2x8x68xf32, #tpu.memory_space<vmem>>, vector<1x8x68xf32>
    %18 = vector.shape_cast %17 : vector<1x8x68xf32> to vector<8x68xf32>
    %cst_14 = arith.constant 1.000000e+00 : f32
    %19 = vector.broadcast %cst_14 : f32 to vector<8x68xf32>
    %20 = arith.cmpf ogt, %18, %19 : vector<8x68xf32>
    %21 = arith.andi %20, %14 : vector<8x68xi1>
    %22 = arith.extui %21 : vector<8x68xi1> to vector<8x68xi32>
    %23 = arith.sitofp %22 : vector<8x68xi32> to vector<8x68xf32>
    %24 = vector.extract_strided_slice %10 {offsets = [0, 0, 0], sizes = [1, 8, 68], strides = [1, 1, 1]} : vector<8x8x68xf32> to vector<1x8x68xf32>
    %25 = vector.shape_cast %24 : vector<1x8x68xf32> to vector<8x68xf32>
    %cst_15 = arith.constant dense<0.000000e+00> : vector<8x68xf32>
    %26 = tpu.matmul %23, %11, %cst_15 {dimension_numbers = #tpu.dot_dimension_numbers<[1], [0], [0], [1], [0, 0, 1, 1], [], []>} : vector<8x68xf32>, vector<68x68xf32>, vector<8x68xf32> -> vector<8x68xf32>
    %27 = arith.addf %25, %26 : vector<8x68xf32>
    %cst_16 = arith.constant 0.818730771 : f32
    %28 = vector.broadcast %cst_16 : f32 to vector<8x68xf32>
    %29 = arith.mulf %28, %18 : vector<8x68xf32>
    %cst_17 = arith.constant 0.181269243 : f32
    %30 = vector.broadcast %cst_17 : f32 to vector<8x68xf32>
    %31 = arith.mulf %30, %16 : vector<8x68xf32>
    %32 = arith.addf %29, %31 : vector<8x68xf32>
    %33 = arith.subf %32, %23 : vector<8x68xf32>
    %cst_18 = arith.constant 0.606530666 : f32
    %34 = vector.broadcast %cst_18 : f32 to vector<8x68xf32>
    %35 = arith.mulf %34, %16 : vector<8x68xf32>
    %36 = arith.addf %35, %27 : vector<8x68xf32>
    %37 = vector.extract_strided_slice %33 {offsets = [0, 64], sizes = [8, 4], strides = [1, 1]} : vector<8x68xf32> to vector<8x4xf32>
    %38 = math.tanh %37 : vector<8x4xf32>
    %c0_19 = arith.constant 0 : index
    %c0_20 = arith.constant 0 : index
    %c0_21 = arith.constant 0 : index
    %39 = vector.load %arg6[%c0_19, %c0_20, %c0_21] : memref<8x8x4xf32, #tpu.memory_space<vmem>>, vector<1x8x4xf32>
    %40 = vector.shape_cast %39 : vector<1x8x4xf32> to vector<8x4xf32>
    %41 = vector.shape_cast %38 : vector<8x4xf32> to vector<1x8x4xf32>
    tpu.vector_store %arg6[%c0_19, %c0_20, %c0_21], %41 {strides = array<i32>} : memref<8x8x4xf32, #tpu.memory_space<vmem>>, vector<1x8x4xf32>,
    %cst_22 = arith.constant 1.000000e+00 : f32
    %42 = vector.broadcast %cst_22 : f32 to vector<8x68xf32>
    %43 = arith.cmpf ogt, %33, %42 : vector<8x68xf32>
    %44 = arith.andi %43, %14 : vector<8x68xi1>
    %45 = arith.extui %44 : vector<8x68xi1> to vector<8x68xi32>
    %46 = arith.sitofp %45 : vector<8x68xi32> to vector<8x68xf32>
    %47 = vector.extract_strided_slice %10 {offsets = [1, 0, 0], sizes = [1, 8, 68], strides = [1, 1, 1]} : vector<8x8x68xf32> to vector<1x8x68xf32>
    %48 = vector.shape_cast %47 : vector<1x8x68xf32> to vector<8x68xf32>
    %cst_23 = arith.constant dense<0.000000e+00> : vector<8x68xf32>
    %49 = tpu.matmul %46, %11, %cst_23 {dimension_numbers = #tpu.dot_dimension_numbers<[1], [0], [0], [1], [0, 0, 1, 1], [], []>} : vector<8x68xf32>, vector<68x68xf32>, vector<8x68xf32> -> vector<8x68xf32>
    %50 = arith.addf %48, %49 : vector<8x68xf32>
    %cst_24 = arith.constant 0.818730771 : f32
    %51 = vector.broadcast %cst_24 : f32 to vector<8x68xf32>
    %52 = arith.mulf %51, %33 : vector<8x68xf32>
    %cst_25 = arith.constant 0.181269243 : f32
    %53 = vector.broadcast %cst_25 : f32 to vector<8x68xf32>
    %54 = arith.mulf %53, %36 : vector<8x68xf32>
    %55 = arith.addf %52, %54 : vector<8x68xf32>
    %56 = arith.subf %55, %46 : vector<8x68xf32>
    %cst_26 = arith.constant 0.606530666 : f32
    %57 = vector.broadcast %cst_26 : f32 to vector<8x68xf32>
    %58 = arith.mulf %57, %36 : vector<8x68xf32>
    %59 = arith.addf %58, %50 : vector<8x68xf32>
    %60 = vector.extract_strided_slice %56 {offsets = [0, 64], sizes = [8, 4], strides = [1, 1]} : vector<8x68xf32> to vector<8x4xf32>
    %61 = math.tanh %60 : vector<8x4xf32>
    %c1_27 = arith.constant 1 : index
    %c0_28 = arith.constant 0 : index
    %c0_29 = arith.constant 0 : index
    %62 = vector.load %arg6[%c1_27, %c0_28, %c0_29] : memref<8x8x4xf32, #tpu.memory_space<vmem>>, vector<1x8x4xf32>
    %63 = vector.shape_cast %62 : vector<1x8x4xf32> to vector<8x4xf32>
    %64 = vector.shape_cast %61 : vector<8x4xf32> to vector<1x8x4xf32>
    tpu.vector_store %arg6[%c1_27, %c0_28, %c0_29], %64 {strides = array<i32>} : memref<8x8x4xf32, #tpu.memory_space<vmem>>, vector<1x8x4xf32>,
    %cst_30 = arith.constant 1.000000e+00 : f32
    %65 = vector.broadcast %cst_30 : f32 to vector<8x68xf32>
    %66 = arith.cmpf ogt, %56, %65 : vector<8x68xf32>
    %67 = arith.andi %66, %14 : vector<8x68xi1>
    %68 = arith.extui %67 : vector<8x68xi1> to vector<8x68xi32>
    %69 = arith.sitofp %68 : vector<8x68xi32> to vector<8x68xf32>
    %70 = vector.extract_strided_slice %10 {offsets = [2, 0, 0], sizes = [1, 8, 68], strides = [1, 1, 1]} : vector<8x8x68xf32> to vector<1x8x68xf32>
    %71 = vector.shape_cast %70 : vector<1x8x68xf32> to vector<8x68xf32>
    %cst_31 = arith.constant dense<0.000000e+00> : vector<8x68xf32>
    %72 = tpu.matmul %69, %11, %cst_31 {dimension_numbers = #tpu.dot_dimension_numbers<[1], [0], [0], [1], [0, 0, 1, 1], [], []>} : vector<8x68xf32>, vector<68x68xf32>, vector<8x68xf32> -> vector<8x68xf32>
    %73 = arith.addf %71, %72 : vector<8x68xf32>
    %cst_32 = arith.constant 0.818730771 : f32
    %74 = vector.broadcast %cst_32 : f32 to vector<8x68xf32>
    %75 = arith.mulf %74, %56 : vector<8x68xf32>
    %cst_33 = arith.constant 0.181269243 : f32
    %76 = vector.broadcast %cst_33 : f32 to vector<8x68xf32>
    %77 = arith.mulf %76, %59 : vector<8x68xf32>
    %78 = arith.addf %75, %77 : vector<8x68xf32>
    %79 = arith.subf %78, %69 : vector<8x68xf32>
    %cst_34 = arith.constant 0.606530666 : f32
    %80 = vector.broadcast %cst_34 : f32 to vector<8x68xf32>
    %81 = arith.mulf %80, %59 : vector<8x68xf32>
    %82 = arith.addf %81, %73 : vector<8x68xf32>
    %83 = vector.extract_strided_slice %79 {offsets = [0, 64], sizes = [8, 4], strides = [1, 1]} : vector<8x68xf32> to vector<8x4xf32>
    %84 = math.tanh %83 : vector<8x4xf32>
    %c2 = arith.constant 2 : index
    %c0_35 = arith.constant 0 : index
    %c0_36 = arith.constant 0 : index
    %85 = vector.load %arg6[%c2, %c0_35, %c0_36] : memref<8x8x4xf32, #tpu.memory_space<vmem>>, vector<1x8x4xf32>
    %86 = vector.shape_cast %85 : vector<1x8x4xf32> to vector<8x4xf32>
    %87 = vector.shape_cast %84 : vector<8x4xf32> to vector<1x8x4xf32>
    tpu.vector_store %arg6[%c2, %c0_35, %c0_36], %87 {strides = array<i32>} : memref<8x8x4xf32, #tpu.memory_space<vmem>>, vector<1x8x4xf32>,
    %cst_37 = arith.constant 1.000000e+00 : f32
    %88 = vector.broadcast %cst_37 : f32 to vector<8x68xf32>
    %89 = arith.cmpf ogt, %79, %88 : vector<8x68xf32>
    %90 = arith.andi %89, %14 : vector<8x68xi1>
    %91 = arith.extui %90 : vector<8x68xi1> to vector<8x68xi32>
    %92 = arith.sitofp %91 : vector<8x68xi32> to vector<8x68xf32>
    %93 = vector.extract_strided_slice %10 {offsets = [3, 0, 0], sizes = [1, 8, 68], strides = [1, 1, 1]} : vector<8x8x68xf32> to vector<1x8x68xf32>
    %94 = vector.shape_cast %93 : vector<1x8x68xf32> to vector<8x68xf32>
    %cst_38 = arith.constant dense<0.000000e+00> : vector<8x68xf32>
    %95 = tpu.matmul %92, %11, %cst_38 {dimension_numbers = #tpu.dot_dimension_numbers<[1], [0], [0], [1], [0, 0, 1, 1], [], []>} : vector<8x68xf32>, vector<68x68xf32>, vector<8x68xf32> -> vector<8x68xf32>
    %96 = arith.addf %94, %95 : vector<8x68xf32>
    %cst_39 = arith.constant 0.818730771 : f32
    %97 = vector.broadcast %cst_39 : f32 to vector<8x68xf32>
    %98 = arith.mulf %97, %79 : vector<8x68xf32>
    %cst_40 = arith.constant 0.181269243 : f32
    %99 = vector.broadcast %cst_40 : f32 to vector<8x68xf32>
    %100 = arith.mulf %99, %82 : vector<8x68xf32>
    %101 = arith.addf %98, %100 : vector<8x68xf32>
    %102 = arith.subf %101, %92 : vector<8x68xf32>
    %cst_41 = arith.constant 0.606530666 : f32
    %103 = vector.broadcast %cst_41 : f32 to vector<8x68xf32>
    %104 = arith.mulf %103, %82 : vector<8x68xf32>
    %105 = arith.addf %104, %96 : vector<8x68xf32>
    %106 = vector.extract_strided_slice %102 {offsets = [0, 64], sizes = [8, 4], strides = [1, 1]} : vector<8x68xf32> to vector<8x4xf32>
    %107 = math.tanh %106 : vector<8x4xf32>
    %c3 = arith.constant 3 : index
    %c0_42 = arith.constant 0 : index
    %c0_43 = arith.constant 0 : index
    %108 = vector.load %arg6[%c3, %c0_42, %c0_43] : memref<8x8x4xf32, #tpu.memory_space<vmem>>, vector<1x8x4xf32>
    %109 = vector.shape_cast %108 : vector<1x8x4xf32> to vector<8x4xf32>
    %110 = vector.shape_cast %107 : vector<8x4xf32> to vector<1x8x4xf32>
    tpu.vector_store %arg6[%c3, %c0_42, %c0_43], %110 {strides = array<i32>} : memref<8x8x4xf32, #tpu.memory_space<vmem>>, vector<1x8x4xf32>,
    %cst_44 = arith.constant 1.000000e+00 : f32
    %111 = vector.broadcast %cst_44 : f32 to vector<8x68xf32>
    %112 = arith.cmpf ogt, %102, %111 : vector<8x68xf32>
    %113 = arith.andi %112, %14 : vector<8x68xi1>
    %114 = arith.extui %113 : vector<8x68xi1> to vector<8x68xi32>
    %115 = arith.sitofp %114 : vector<8x68xi32> to vector<8x68xf32>
    %116 = vector.extract_strided_slice %10 {offsets = [4, 0, 0], sizes = [1, 8, 68], strides = [1, 1, 1]} : vector<8x8x68xf32> to vector<1x8x68xf32>
    %117 = vector.shape_cast %116 : vector<1x8x68xf32> to vector<8x68xf32>
    %cst_45 = arith.constant dense<0.000000e+00> : vector<8x68xf32>
    %118 = tpu.matmul %115, %11, %cst_45 {dimension_numbers = #tpu.dot_dimension_numbers<[1], [0], [0], [1], [0, 0, 1, 1], [], []>} : vector<8x68xf32>, vector<68x68xf32>, vector<8x68xf32> -> vector<8x68xf32>
    %119 = arith.addf %117, %118 : vector<8x68xf32>
    %cst_46 = arith.constant 0.818730771 : f32
    %120 = vector.broadcast %cst_46 : f32 to vector<8x68xf32>
    %121 = arith.mulf %120, %102 : vector<8x68xf32>
    %cst_47 = arith.constant 0.181269243 : f32
    %122 = vector.broadcast %cst_47 : f32 to vector<8x68xf32>
    %123 = arith.mulf %122, %105 : vector<8x68xf32>
    %124 = arith.addf %121, %123 : vector<8x68xf32>
    %125 = arith.subf %124, %115 : vector<8x68xf32>
    %cst_48 = arith.constant 0.606530666 : f32
    %126 = vector.broadcast %cst_48 : f32 to vector<8x68xf32>
    %127 = arith.mulf %126, %105 : vector<8x68xf32>
    %128 = arith.addf %127, %119 : vector<8x68xf32>
    %129 = vector.extract_strided_slice %125 {offsets = [0, 64], sizes = [8, 4], strides = [1, 1]} : vector<8x68xf32> to vector<8x4xf32>
    %130 = math.tanh %129 : vector<8x4xf32>
    %c4 = arith.constant 4 : index
    %c0_49 = arith.constant 0 : index
    %c0_50 = arith.constant 0 : index
    %131 = vector.load %arg6[%c4, %c0_49, %c0_50] : memref<8x8x4xf32, #tpu.memory_space<vmem>>, vector<1x8x4xf32>
    %132 = vector.shape_cast %131 : vector<1x8x4xf32> to vector<8x4xf32>
    %133 = vector.shape_cast %130 : vector<8x4xf32> to vector<1x8x4xf32>
    tpu.vector_store %arg6[%c4, %c0_49, %c0_50], %133 {strides = array<i32>} : memref<8x8x4xf32, #tpu.memory_space<vmem>>, vector<1x8x4xf32>,
    %cst_51 = arith.constant 1.000000e+00 : f32
    %134 = vector.broadcast %cst_51 : f32 to vector<8x68xf32>
    %135 = arith.cmpf ogt, %125, %134 : vector<8x68xf32>
    %136 = arith.andi %135, %14 : vector<8x68xi1>
    %137 = arith.extui %136 : vector<8x68xi1> to vector<8x68xi32>
    %138 = arith.sitofp %137 : vector<8x68xi32> to vector<8x68xf32>
    %139 = vector.extract_strided_slice %10 {offsets = [5, 0, 0], sizes = [1, 8, 68], strides = [1, 1, 1]} : vector<8x8x68xf32> to vector<1x8x68xf32>
    %140 = vector.shape_cast %139 : vector<1x8x68xf32> to vector<8x68xf32>
    %cst_52 = arith.constant dense<0.000000e+00> : vector<8x68xf32>
    %141 = tpu.matmul %138, %11, %cst_52 {dimension_numbers = #tpu.dot_dimension_numbers<[1], [0], [0], [1], [0, 0, 1, 1], [], []>} : vector<8x68xf32>, vector<68x68xf32>, vector<8x68xf32> -> vector<8x68xf32>
    %142 = arith.addf %140, %141 : vector<8x68xf32>
    %cst_53 = arith.constant 0.818730771 : f32
    %143 = vector.broadcast %cst_53 : f32 to vector<8x68xf32>
    %144 = arith.mulf %143, %125 : vector<8x68xf32>
    %cst_54 = arith.constant 0.181269243 : f32
    %145 = vector.broadcast %cst_54 : f32 to vector<8x68xf32>
    %146 = arith.mulf %145, %128 : vector<8x68xf32>
    %147 = arith.addf %144, %146 : vector<8x68xf32>
    %148 = arith.subf %147, %138 : vector<8x68xf32>
    %cst_55 = arith.constant 0.606530666 : f32
    %149 = vector.broadcast %cst_55 : f32 to vector<8x68xf32>
    %150 = arith.mulf %149, %128 : vector<8x68xf32>
    %151 = arith.addf %150, %142 : vector<8x68xf32>
    %152 = vector.extract_strided_slice %148 {offsets = [0, 64], sizes = [8, 4], strides = [1, 1]} : vector<8x68xf32> to vector<8x4xf32>
    %153 = math.tanh %152 : vector<8x4xf32>
    %c5 = arith.constant 5 : index
    %c0_56 = arith.constant 0 : index
    %c0_57 = arith.constant 0 : index
    %154 = vector.load %arg6[%c5, %c0_56, %c0_57] : memref<8x8x4xf32, #tpu.memory_space<vmem>>, vector<1x8x4xf32>
    %155 = vector.shape_cast %154 : vector<1x8x4xf32> to vector<8x4xf32>
    %156 = vector.shape_cast %153 : vector<8x4xf32> to vector<1x8x4xf32>
    tpu.vector_store %arg6[%c5, %c0_56, %c0_57], %156 {strides = array<i32>} : memref<8x8x4xf32, #tpu.memory_space<vmem>>, vector<1x8x4xf32>,
    %cst_58 = arith.constant 1.000000e+00 : f32
    %157 = vector.broadcast %cst_58 : f32 to vector<8x68xf32>
    %158 = arith.cmpf ogt, %148, %157 : vector<8x68xf32>
    %159 = arith.andi %158, %14 : vector<8x68xi1>
    %160 = arith.extui %159 : vector<8x68xi1> to vector<8x68xi32>
    %161 = arith.sitofp %160 : vector<8x68xi32> to vector<8x68xf32>
    %162 = vector.extract_strided_slice %10 {offsets = [6, 0, 0], sizes = [1, 8, 68], strides = [1, 1, 1]} : vector<8x8x68xf32> to vector<1x8x68xf32>
    %163 = vector.shape_cast %162 : vector<1x8x68xf32> to vector<8x68xf32>
    %cst_59 = arith.constant dense<0.000000e+00> : vector<8x68xf32>
    %164 = tpu.matmul %161, %11, %cst_59 {dimension_numbers = #tpu.dot_dimension_numbers<[1], [0], [0], [1], [0, 0, 1, 1], [], []>} : vector<8x68xf32>, vector<68x68xf32>, vector<8x68xf32> -> vector<8x68xf32>
    %165 = arith.addf %163, %164 : vector<8x68xf32>
    %cst_60 = arith.constant 0.818730771 : f32
    %166 = vector.broadcast %cst_60 : f32 to vector<8x68xf32>
    %167 = arith.mulf %166, %148 : vector<8x68xf32>
    %cst_61 = arith.constant 0.181269243 : f32
    %168 = vector.broadcast %cst_61 : f32 to vector<8x68xf32>
    %169 = arith.mulf %168, %151 : vector<8x68xf32>
    %170 = arith.addf %167, %169 : vector<8x68xf32>
    %171 = arith.subf %170, %161 : vector<8x68xf32>
    %cst_62 = arith.constant 0.606530666 : f32
    %172 = vector.broadcast %cst_62 : f32 to vector<8x68xf32>
    %173 = arith.mulf %172, %151 : vector<8x68xf32>
    %174 = arith.addf %173, %165 : vector<8x68xf32>
    %175 = vector.extract_strided_slice %171 {offsets = [0, 64], sizes = [8, 4], strides = [1, 1]} : vector<8x68xf32> to vector<8x4xf32>
    %176 = math.tanh %175 : vector<8x4xf32>
    %c6 = arith.constant 6 : index
    %c0_63 = arith.constant 0 : index
    %c0_64 = arith.constant 0 : index
    %177 = vector.load %arg6[%c6, %c0_63, %c0_64] : memref<8x8x4xf32, #tpu.memory_space<vmem>>, vector<1x8x4xf32>
    %178 = vector.shape_cast %177 : vector<1x8x4xf32> to vector<8x4xf32>
    %179 = vector.shape_cast %176 : vector<8x4xf32> to vector<1x8x4xf32>
    tpu.vector_store %arg6[%c6, %c0_63, %c0_64], %179 {strides = array<i32>} : memref<8x8x4xf32, #tpu.memory_space<vmem>>, vector<1x8x4xf32>,
    %cst_65 = arith.constant 1.000000e+00 : f32
    %180 = vector.broadcast %cst_65 : f32 to vector<8x68xf32>
    %181 = arith.cmpf ogt, %171, %180 : vector<8x68xf32>
    %182 = arith.andi %181, %14 : vector<8x68xi1>
    %183 = arith.extui %182 : vector<8x68xi1> to vector<8x68xi32>
    %184 = arith.sitofp %183 : vector<8x68xi32> to vector<8x68xf32>
    %185 = vector.extract_strided_slice %10 {offsets = [7, 0, 0], sizes = [1, 8, 68], strides = [1, 1, 1]} : vector<8x8x68xf32> to vector<1x8x68xf32>
    %186 = vector.shape_cast %185 : vector<1x8x68xf32> to vector<8x68xf32>
    %cst_66 = arith.constant dense<0.000000e+00> : vector<8x68xf32>
    %187 = tpu.matmul %184, %11, %cst_66 {dimension_numbers = #tpu.dot_dimension_numbers<[1], [0], [0], [1], [0, 0, 1, 1], [], []>} : vector<8x68xf32>, vector<68x68xf32>, vector<8x68xf32> -> vector<8x68xf32>
    %188 = arith.addf %186, %187 : vector<8x68xf32>
    %cst_67 = arith.constant 0.818730771 : f32
    %189 = vector.broadcast %cst_67 : f32 to vector<8x68xf32>
    %190 = arith.mulf %189, %171 : vector<8x68xf32>
    %cst_68 = arith.constant 0.181269243 : f32
    %191 = vector.broadcast %cst_68 : f32 to vector<8x68xf32>
    %192 = arith.mulf %191, %174 : vector<8x68xf32>
    %193 = arith.addf %190, %192 : vector<8x68xf32>
    %194 = arith.subf %193, %184 : vector<8x68xf32>
    %cst_69 = arith.constant 0.606530666 : f32
    %195 = vector.broadcast %cst_69 : f32 to vector<8x68xf32>
    %196 = arith.mulf %195, %174 : vector<8x68xf32>
    %197 = arith.addf %196, %188 : vector<8x68xf32>
    %198 = vector.extract_strided_slice %194 {offsets = [0, 64], sizes = [8, 4], strides = [1, 1]} : vector<8x68xf32> to vector<8x4xf32>
    %199 = math.tanh %198 : vector<8x4xf32>
    %c7 = arith.constant 7 : index
    %c0_70 = arith.constant 0 : index
    %c0_71 = arith.constant 0 : index
    %200 = vector.load %arg6[%c7, %c0_70, %c0_71] : memref<8x8x4xf32, #tpu.memory_space<vmem>>, vector<1x8x4xf32>
    %201 = vector.shape_cast %200 : vector<1x8x4xf32> to vector<8x4xf32>
    %202 = vector.shape_cast %199 : vector<8x4xf32> to vector<1x8x4xf32>
    tpu.vector_store %arg6[%c7, %c0_70, %c0_71], %202 {strides = array<i32>} : memref<8x8x4xf32, #tpu.memory_space<vmem>>, vector<1x8x4xf32>,
    %c0_72 = arith.constant 0 : index
    %c0_73 = arith.constant 0 : index
    %c0_74 = arith.constant 0 : index
    %203 = vector.load %arg7[%c0_72, %c0_73, %c0_74] : memref<2x8x68xf32, #tpu.memory_space<vmem>>, vector<1x8x68xf32>
    %204 = vector.shape_cast %203 : vector<1x8x68xf32> to vector<8x68xf32>
    %205 = vector.shape_cast %197 : vector<8x68xf32> to vector<1x8x68xf32>
    tpu.vector_store %arg7[%c0_72, %c0_73, %c0_74], %205 {strides = array<i32>} : memref<2x8x68xf32, #tpu.memory_space<vmem>>, vector<1x8x68xf32>,
    %c1_75 = arith.constant 1 : index
    %c0_76 = arith.constant 0 : index
    %c0_77 = arith.constant 0 : index
    %206 = vector.load %arg7[%c1_75, %c0_76, %c0_77] : memref<2x8x68xf32, #tpu.memory_space<vmem>>, vector<1x8x68xf32>
    %207 = vector.shape_cast %206 : vector<1x8x68xf32> to vector<8x68xf32>
    %208 = vector.shape_cast %194 : vector<8x68xf32> to vector<1x8x68xf32>
    tpu.vector_store %arg7[%c1_75, %c0_76, %c0_77], %208 {strides = array<i32>} : memref<2x8x68xf32, #tpu.memory_space<vmem>>, vector<1x8x68xf32>,
    return
  }
  func.func @transform_0(%arg0: i32, %arg1: i32) -> (i32, i32, i32) {
    %c0_i32 = arith.constant 0 : i32
    %c0_i32_0 = arith.constant 0 : i32
    return %arg1, %arg0, %c0_i32 : i32, i32, i32
  }
  func.func @transform_1(%arg0: i32, %arg1: i32) -> (i32, i32) {
    %c0_i32 = arith.constant 0 : i32
    %c0_i32_0 = arith.constant 0 : i32
    %c0_i32_1 = arith.constant 0 : i32
    return %c0_i32, %c0_i32_0 : i32, i32
  }
  func.func @transform_2(%arg0: i32, %arg1: i32) -> (i32, i32) {
    %c0_i32 = arith.constant 0 : i32
    %c0_i32_0 = arith.constant 0 : i32
    %c0_i32_1 = arith.constant 0 : i32
    return %c0_i32, %c0_i32_0 : i32, i32
  }
  func.func @transform_3(%arg0: i32, %arg1: i32) -> (i32, i32) {
    %c0_i32 = arith.constant 0 : i32
    %c0_i32_0 = arith.constant 0 : i32
    %c0_i32_1 = arith.constant 0 : i32
    return %c0_i32, %c0_i32_0 : i32, i32
  }
  func.func @transform_4(%arg0: i32, %arg1: i32) -> (i32, i32, i32) {
    %c0_i32 = arith.constant 0 : i32
    %c0_i32_0 = arith.constant 0 : i32
    return %arg1, %arg0, %c0_i32 : i32, i32, i32
  }
}

</mosaic_0001>

<bundles_post_ra>
// kernel: tpu_custom_call.1
= control target key start
LH: loop header
LB: loop body
LE: loop exit
PB: predicated region body
PF: predicated region fallthrough
CT: control target
= control target key end

     0   :  { %s1077_s15 = smov 0   ;;  %s1079_s16 = smov 0   ;;  %s1400_s0 = inlined_call_operand.vmem [shape: f32[32,16,16], index: 0, kind: input, shape index: {}]   ;;  %s1401_s1 = inlined_call_operand.vmem [shape: f32[16,68], index: 1, kind: input, shape index: {}]   ;;  %s1402_s2 = inlined_call_operand.vmem [shape: f32[68,68], index: 2, kind: input, shape index: {}]   ;;  %s1403_s3 = inlined_call_operand.vmem [shape: f32[1,68], index: 3, kind: input, shape index: {}]   ;;  %s1404_s4 = inlined_call_operand.vmem [shape: f32[32,16,4], index: 4, kind: output, shape index: {}]  }
   0x1   :  { %s1081_s17 = smov 0   ;;  %s1083_s18 = smov 0  }
   0x2   :  { %s1085_s19 = smov 0   ;;  %s1087_s20 = smov 0  }
   0x3   :  { %s1089_s21 = smov 0  }
   0x4 LB: > { %s23_s22 = sadd.s32 1, %s1039_s19  ;;  %s26_s23 = sadd.s32 1, %s1043_s20  ;;  %s1047_s21 = sphi %s1089_s21, %s14_s21   ;;  %s1043_s20 = sphi %s1087_s20, %s1411_s20   ;;  %s1039_s19 = sphi %s1085_s19, %s1410_s19   ;;  %s1035_s18 = sphi %s1083_s18, %s1409_s18   ;;  %s1031_s17 = sphi %s1081_s17, %s1408_s17   ;;  %s1027_s16 = sphi %s1079_s16, %s1407_s16   ;;  %s1023_s15 = sphi %s1077_s15, %s1406_s15  }
   0x5   : > { %p24_p0 = scmp.ge.s32.totalorder %s23_s22, 4  ;;  %s858_s24 = sadd.s32 4294967295, %s1047_s21  }
   0x6   : > { %p42_p1 = scmp.ne.s32.totalorder %s1027_s16, %s1023_s15  ;;  %p43_p2 = scmp.eq.s32.totalorder %s1047_s21, 0 }
   0x7   : > { %s1413_s22 = smov (%p24_p0, %s23_s22), 0  ;;  %s1415_s23 = smov (!%p24_p0, %s26_s23), %s1043_s20 }
   0x8   : > { %p28_p3 = scmp.ge.s32.totalorder %s1415_s23, 2  ;;  %p137_p4 = scmp.eq.s32.totalorder %s858_s24, 7 }
   0x9   : > { %s30_s25 = ssub.s32 %s1039_s19, %s1413_s22  ;;  %p44_p5 = por %p43_p2, %p42_p1 }
   0xa   : > { %s1417_s23 = smov (%p28_p3, %s1415_s23), 0  ;;  %p1125_p6 = por %p137_p4, %p42_p1 }
   0xb   : > { %s31_s27 = ssub.s32 %s1043_s20, %s1417_s23  ;;  %s35_s29 = sadd.s32 1, %s1027_s16 }
   0xc   : > { %s32_s28 = sor.u32 %s31_s27, %s30_s25  ;;  %p861_p8 = scmp.ge.s32.totalorder %s1047_s21, 8 }
   0xd   : > { %p33_p7 = scmp.eq.s32.totalorder %s32_s28, 0 }
   0xe   : > { %168 = sbr.rel (%p861_p8) target bundleno = 33 (0x21), region = 28 }
   0xf   : > { %s1133_s30 = scalar_select %p33_p7, %s1027_s16, %s35_s29  }
  0x13   : > { %171 = sbr.rel (!%p44_p5) target bundleno = 33 (0x21), region = 32  ;;  %s173_s5 = sand.u32 (%p44_p5), 1, %s1027_s16  }
  0x14   : > { %s915_s6 = sshll.u32 (%p44_p5), %s1039_s19, 4  ;;  %s862_s7 = sshll.u32 (%p44_p5), %s173_s5, 6 }
  0x15   : > { %s178_s8 = sadd.s32 (%p44_p5), %s1043_s20, %s915_s6  ;;  %s175_s13 = scalar_lea.vmem (%p44_p5), [#allocation3], %s862_s7 }
  0x16   : > { %s865_s9 = sshll.u32 (%p44_p5), %s178_s8, 3 }
  0x17   : > { %s180_s12 = scalar_lea.vmem (%p44_p5), %s1400_s0, %s865_s9 }
  0x18   : > { %v223_v0 = vld [vmem:[%s180_s12] sm:$0xff]  ;;  %v225_v1 = vld [vmem:[%s180_s12 + $0x10] sm:$0xff] }
  0x19   : > { %v227_v2 = vld [vmem:[%s180_s12 + $0x20] sm:$0xff]  ;;  %224 = vst [vmem:[%s175_s13] sm:$0xff] %v223_v0  ;;  %v229_v3 = vld [vmem:[%s180_s12 + $0x30] sm:$0xff] }
  0x1a   : > { %226 = vst [vmem:[%s175_s13 + $0x8] sm:$0xff] %v225_v1  ;;  %v231_v4 = vld [vmem:[%s180_s12 + $0x40] sm:$0xff]  ;;  %v233_v5 = vld [vmem:[%s180_s12 + $0x50] sm:$0xff] }
  0x1b   : > { %228 = vst [vmem:[%s175_s13 + $0x10] sm:$0xff] %v227_v2  ;;  %v235_v6 = vld [vmem:[%s180_s12 + $0x60] sm:$0xff]  ;;  %v237_v7 = vld [vmem:[%s180_s12 + $0x70] sm:$0xff] }
  0x1c   : > { %230 = vst [vmem:[%s175_s13 + $0x18] sm:$0xff] %v229_v3 }
  0x1d   : > { %232 = vst [vmem:[%s175_s13 + $0x20] sm:$0xff] %v231_v4 }
  0x1e   : > { %234 = vst [vmem:[%s175_s13 + $0x28] sm:$0xff] %v233_v5 }
  0x1f   : > { %236 = vst [vmem:[%s175_s13 + $0x30] sm:$0xff] %v235_v6 }
  0x20   : > { %238 = vst [vmem:[%s175_s13 + $0x38] sm:$0xff] %v237_v7 }
  0x21 PF: > { %p866_p9 = scmp.ge.s32.totalorder %s1047_s21, 1  ;;  %p243_p10 = scmp.lt.s32.totalorder %s1047_s21, 9 }
  0x23   : > { %p244_p11 = pnand %p866_p9, %p243_p10 }
  0x24   : > { %s250_s14 = sand.u32 (!%p244_p11), 1, %s1023_s15   ;;  %p869_p12 = scmp.ne.s32.totalorder (!%p244_p11), %s1031_s17, 0 }
  0x25   : > { %247 = sbr.rel (%p244_p11) target bundleno = 764 (0x2fc), region = 70  ;;  %s867_s24 = sshll.u32 (!%p244_p11), %s250_s14, 6 }
  0x26   : > { %s1145_s25 = scalar_lea.vmem (!%p244_p11), [#allocation3], %s867_s24  ;;  %s1147_s27 = scalar_lea.vmem (!%p244_p11), [#allocation4], %s867_s24 }
  0x2a   : > { %279 = sbr.rel (%p869_p12) target bundleno = 50 (0x32), region = 78 }
  0x2f   : > { %vm280_vm0 = vcmask 556032   ;;  %v1049_v8 = vmov 0.0  }
  0x30   : > { %281 = vst.msk [vmem:[#allocation2] sm:$0xff] %vm280_vm0, %v1049_v8 }
  0x31   : > { %282 = vst.msk [vmem:[#allocation2 + $0x8] sm:$0xff] %vm280_vm0, %v1049_v8 }
  0x32 PF: > { %v1153_v9 = vld [vmem:[%s1402_s2 + $0x40] sm:$0xf]  ;;  %vm386_vm1 = vcmask 1043456   ;;  %v1158_v10 = vld [vmem:[%s1402_s2 + $0x38] sm:$0xff]  ;;  %v372_v11 = vlaneseq  ;;  %v292_v12 = vld [vmem:[%s1401_s1 + $0x8] sm:$0xff]  ;;  %vm297_vm2 = vcmask 130048  }
  0x33   : > { %879 = vmatpush.msk.msra.mxu1 %vm386_vm1, %v1153_v9  ;;  %882 = vmatpush.msk.msra.mxu2 %vm386_vm1, %v1153_v9  ;;  %v1170_v13 = vld [vmem:[%s1402_s2 + $0x30] sm:$0xff]  ;;  %v291_v14 = vld [vmem:[%s1401_s1] sm:$0xff]  ;;  %v1185_v17 = vld [vmem:[%s1402_s2 + $0x28] sm:$0xff]  ;;  %v1050_v23 = vmov 0.0   ;;  %vm382_vm8 = vcmask 556032   ;;  %s1051_s10 = smov 64  }
  0x34   : > { %336 = vmatpush.msra.mxu0 %v292_v12  ;;  %v1175_v15 = vand.u32 127, %v372_v11  ;;  %886 = vmatpush.msk.msra.mxu3 %vm386_vm1, %v1153_v9  ;;  %v283_v16 = vld [vmem:[%s1145_s25] sm:$0xff]  ;;  %v1197_v22 = vld [vmem:[%s1402_s2 + $0x20] sm:$0xff]  ;;  %v1209_v26 = vld [vmem:[%s1402_s2 + $0x18] sm:$0xff]  ;;  %vm422_vm13 = vcmask 31744  }
  0x35   : > { %398 = vmatpush.msra.mxu1 %v1158_v10  ;;  %439 = vmatpush.msra.mxu2 %v1158_v10  ;;  %v1219_v28 = vld [vmem:[%s1402_s2 + $0x10] sm:$0xff]  ;;  %v284_v29 = vld [vmem:[%s1145_s25 + $0x8] sm:$0xff]  ;;  %v364_v30 = vld [vmem:[%s1402_s2 + $0x8] sm:$0xff] }
  0x36   : > { %337 = vmatpush.msra.mxu0 %v291_v14  ;;  %vm374_vm3 = vcmp.lt.s32.totalorder %v1175_v15, 64  ;;  %480 = vmatpush.msra.mxu3 %v1158_v10  ;;  %v363_v31 = vld [vmem:[%s1402_s2] sm:$0xff]  ;;  %v286_v35 = vld [vmem:[%s1145_s25 + $0x18] sm:$0xff]  ;;  %v287_v62 = vld [vmem:[%s1145_s25 + $0x20] sm:$0xff] }
  0x37   : > { %v1188_v18 = vld [vmem:[#allocation2] sm:$0xff]  ;;  %399 = vmatpush.msra.mxu1 %v1170_v13  ;;  %440 = vmatpush.msra.mxu2 %v1170_v13  ;;  %v288_v1 = vld [vmem:[%s1145_s25 + $0x28] sm:$0xff] }
  0x38   : > { %v377_v19 = vld [vmem:[#allocation2 + $0x8] sm:$0xff]  ;;  %v412_v21 = vmul.f32 0.18126924, %v1188_v18  ;;  %870 = vmatmul.msk.f32.vlgmr.msra.gmra.mxu0 %vm297_vm2, %v283_v16  ;;  %481 = vmatpush.msra.mxu3 %v1170_v13  ;;  %v285_v34 = vld [vmem:[%s1145_s25 + $0x10] sm:$0xff]  ;;  %v415_v39 = vmul.f32 0.60653067, %v1188_v18 }
  0x39   : > { %vm378_vm4 = vcmp.gt.f32.partialorder %v377_v19, 1.0  ;;  %v411_v20 = vmul.f32 0.8187308, %v377_v19  ;;  %400 = vmatpush.msra.mxu1 %v1185_v17  ;;  %441 = vmatpush.msra.mxu2 %v1185_v17  ;;  %v1294_v37 = vld [vmem:[%s1403_s3] ss:$0 sm:$0xff] }
  0x3a   : > { %vm379_vm5 = vmand %vm378_vm4, %vm374_vm3  ;;  %482 = vmatpush.msra.mxu3 %v1185_v17 }
  0x3b   : > { %v878_v24 = vsel %vm379_vm5, 1.0, %v1050_v23  ;;  %v413_v25 = vadd.f32 %v412_v21, %v411_v20  ;;  %401 = vmatpush.msra.mxu1 %v1197_v22  ;;  %442 = vmatpush.msra.mxu2 %v1197_v22 }
  0x3c   : > { %483 = vmatpush.msra.mxu3 %v1197_v22 }
  0x3d   : > { %v1214_v27 = vsub.f32 %v413_v25, %v878_v24  ;;  %402 = vmatpush.msra.mxu1 %v1209_v26  ;;  %443 = vmatpush.msra.mxu2 %v1209_v26 }
  0x3e   : > { %484 = vmatpush.msra.mxu3 %v1209_v26 }
  0x3f   : > { %vm424_vm6 = vcmp.gt.f32.partialorder %v1214_v27, 1.0  ;;  %403 = vmatpush.msra.mxu1 %v1219_v28  ;;  %444 = vmatpush.msra.mxu2 %v1219_v28  ;;  %977 = vtanh.f32 %v1214_v27  ;;  %v452_v43 = vmul.f32 0.8187308, %v1214_v27 }
  0x40   : > { %vm425_vm7 = vmand %vm424_vm6, %vm374_vm3  ;;  %871 = vmatmul.msk.f32.gmra.mxu0 %vm297_vm2, %v284_v29  ;;  %485 = vmatpush.msra.mxu3 %v1219_v28  ;;  %v289_v29 = vld [vmem:[%s1145_s25 + $0x30] sm:$0xff] }
  0x41   : > { %404 = vmatpush.msra.mxu1 %v364_v30  ;;  %445 = vmatpush.msra.mxu2 %v364_v30  ;;  %v1240_v32 = vsel %vm425_vm7, 1.0, %v1050_v23 }
  0x42   : > { %486 = vmatpush.msra.mxu3 %v364_v30 }
  0x43   : > { %405 = vmatpush.msra.mxu1 %v363_v31  ;;  %446 = vmatpush.msra.mxu2 %v363_v31 }
  0x44   : > { %880 = vmatmul.msk.f32.vlgmr.msra.gmra.mxu1 %vm382_vm8, %v878_v24  ;;  %883 = vmatmul.msk.f32.vlgmr.msra.gmra.mxu2 %vm382_vm8, %v1240_v32 }
  0x45   : > { %890 = vmatpush.msk.msrb.mxu1 %vm386_vm1, %v1153_v9  ;;  %487 = vmatpush.msra.mxu3 %v363_v31  ;;  %v978_v33 = vpop.eup %977 }
  0x46   : > { %894 = vmatpush.msk.msrb.mxu2 %vm386_vm1, %v1153_v9  ;;  %419 = vrot.lane.b32.xlu0 %v978_v33, %s1051_s10 }
  0x47   : > { %898 = vmatpush.msk.msrb.mxu3 %vm386_vm1, %v1153_v9  ;;  %521 = vmatpush.msrb.mxu1 %v1158_v10 }
  0x48   : > { %562 = vmatpush.msrb.mxu2 %v1158_v10  ;;  %872 = vmatmul.msk.f32.gmra.mxu0 %vm297_vm2, %v285_v34 }
  0x49   : > { %603 = vmatpush.msrb.mxu3 %v1158_v10  ;;  %522 = vmatpush.msrb.mxu1 %v1170_v13 }
  0x4a   : > { %563 = vmatpush.msrb.mxu2 %v1170_v13 }
  0x4b   : > { %604 = vmatpush.msrb.mxu3 %v1170_v13  ;;  %523 = vmatpush.msrb.mxu1 %v1185_v17 }
  0x4c   : > { %564 = vmatpush.msrb.mxu2 %v1185_v17 }
  0x4d   : > { %605 = vmatpush.msrb.mxu3 %v1185_v17  ;;  %524 = vmatpush.msrb.mxu1 %v1197_v22 }
  0x4e   : > { %565 = vmatpush.msrb.mxu2 %v1197_v22 }
  0x4f   : > { %606 = vmatpush.msrb.mxu3 %v1197_v22  ;;  %525 = vmatpush.msrb.mxu1 %v1209_v26 }
  0x50   : > { %566 = vmatpush.msrb.mxu2 %v1209_v26  ;;  %873 = vmatmul.msk.f32.gmra.mxu0 %vm297_vm2, %v286_v35 }
  0x51   : > { %607 = vmatpush.msrb.mxu3 %v1209_v26  ;;  %526 = vmatpush.msrb.mxu1 %v1219_v28 }
  0x52   : > { %567 = vmatpush.msrb.mxu2 %v1219_v28 }
  0x53   : > { %608 = vmatpush.msrb.mxu3 %v1219_v28  ;;  %527 = vmatpush.msrb.mxu1 %v364_v30 }
  0x54   : > { %568 = vmatpush.msrb.mxu2 %v364_v30 }
  0x55   : > { %609 = vmatpush.msrb.mxu3 %v364_v30  ;;  %528 = vmatpush.msrb.mxu1 %v363_v31 }
  0x56   : > { %569 = vmatpush.msrb.mxu2 %v363_v31 }
  0x57   : > { %610 = vmatpush.msrb.mxu3 %v363_v31  ;;  %902 = vmatpush.msk.msra.mxu1 %vm386_vm1, %v1153_v9 }
  0x58   : > { %906 = vmatpush.msk.msra.mxu2 %vm386_vm1, %v1153_v9  ;;  %874 = vmatmul.msk.f32.gmra.mxu0 %vm297_vm2, %v287_v62 }
  0x59   : > { %644 = vmatpush.msra.mxu1 %v1158_v10 }
  0x5a   : > { %685 = vmatpush.msra.mxu2 %v1158_v10 }
  0x5b   : > { %645 = vmatpush.msra.mxu1 %v1170_v13 }
  0x5c   : > { %686 = vmatpush.msra.mxu2 %v1170_v13 }
  0x5d   : > { %646 = vmatpush.msra.mxu1 %v1185_v17 }
  0x5e   : > { %687 = vmatpush.msra.mxu2 %v1185_v17 }
  0x5f   : > { %647 = vmatpush.msra.mxu1 %v1197_v22 }
  0x60   : > { %688 = vmatpush.msra.mxu2 %v1197_v22  ;;  %875 = vmatmul.msk.f32.gmra.mxu0 %vm297_vm2, %v288_v1 }
  0x61   : > { %648 = vmatpush.msra.mxu1 %v1209_v26 }
  0x62   : > { %689 = vmatpush.msra.mxu2 %v1209_v26 }
  0x63   : > { %649 = vmatpush.msra.mxu1 %v1219_v28 }
  0x64   : > { %690 = vmatpush.msra.mxu2 %v1219_v28 }
  0x65   : > { %650 = vmatpush.msra.mxu1 %v364_v30 }
  0x66   : > { %691 = vmatpush.msra.mxu2 %v364_v30 }
  0x67   : > { %651 = vmatpush.msra.mxu1 %v363_v31 }
  0x68   : > { %692 = vmatpush.msra.mxu2 %v363_v31  ;;  %876 = vmatmul.msk.f32.gmra.mxu0 %vm297_vm2, %v289_v29  ;;  %v290_v31 = vld [vmem:[%s1145_s25 + $0x38] sm:$0xff]  ;;  %s916_s25 = sshll.u32 (%p1125_p6), %s1031_s17, 4 }
  0x69   : > { %s722_s13 = sadd.s32 (%p1125_p6), %s1035_s18, %s916_s25 }
  0x6a   : > { %s912_s14 = sshll.u32 (%p1125_p6), %s722_s13, 3 }
  0x6b   : > { %s724_s26 = scalar_lea.vmem (%p1125_p6), %s1404_s4, %s912_s14 }
  0x70   : > { %877 = vmatmul.msk.f32.gmra.mxu0 %vm297_vm2, %v290_v31 }
  0xb5   : > { %v339_v36 = vpop.f32.mrf.mxu0 }
  0xb6   : > { %v340_v38 = vadd.f32 %v1294_v37, %v339_v36 }
  0xb8   : > { %v420_v61 = vpop.permute.xlu0 %419 }
  0xb9   : > { %423 = vst.msk [vmem:[%s1147_s27] sm:$0xff] %vm422_vm13, %v420_v61 }
  0xbd   : > { %v342_v41 = vpop.f32.mrf.mxu0 }
  0xbe   : > { %v343_v45 = vadd.f32 %v1294_v37, %v342_v41 }
  0xc1   : > { %v407_v40 = vpop.f32.mrf.mxu1 }
  0xc2   : > { %v410_v42 = vadd.f32 %v407_v40, %v340_v38 }
  0xc4   : > { %v416_v44 = vadd.f32 %v415_v39, %v410_v42 }
  0xc5   : > { %v345_v0 = vpop.f32.mrf.mxu0 }
  0xc6   : > { %v453_v46 = vmul.f32 0.18126924, %v416_v44  ;;  %v456_v50 = vmul.f32 0.60653067, %v416_v44  ;;  %v346_v3 = vadd.f32 %v1294_v37, %v345_v0 }
  0xc7   : > { %v448_v47 = vpop.f32.mrf.mxu2 }
  0xc8   : > { %v454_v48 = vadd.f32 %v453_v46, %v452_v43  ;;  %v451_v49 = vadd.f32 %v448_v47, %v343_v45 }
  0xca   : > { %v457_v51 = vadd.f32 %v456_v50, %v451_v49  ;;  %v455_v52 = vsub.f32 %v454_v48, %v1240_v32 }
  0xcc   : > { %v494_v53 = vmul.f32 0.18126924, %v457_v51  ;;  %979 = vtanh.f32 %v455_v52  ;;  %vm465_vm9 = vcmp.gt.f32.partialorder %v455_v52, 1.0  ;;  %v493_v54 = vmul.f32 0.8187308, %v455_v52 }
  0xcd   : > { %vm466_vm10 = vmand %vm465_vm9, %vm374_vm3  ;;  %v348_v4 = vpop.f32.mrf.mxu0  ;;  %v497_v8 = vmul.f32 0.60653067, %v457_v51 }
  0xce   : > { %v885_v55 = vsel %vm466_vm10, 1.0, %v1050_v23  ;;  %v495_v56 = vadd.f32 %v494_v53, %v493_v54  ;;  %v349_v6 = vadd.f32 %v1294_v37, %v348_v4 }
  0xcf   : > { %887 = vmatmul.msk.f32.vlgmr.msra.gmra.mxu3 %vm382_vm8, %v885_v55 }
  0xd0   : > { %v496_v57 = vsub.f32 %v495_v56, %v885_v55 }
  0xd2   : > { %v980_v58 = vpop.eup %979  ;;  %vm506_vm11 = vcmp.gt.f32.partialorder %v496_v57, 1.0  ;;  %981 = vtanh.f32 %v496_v57  ;;  %v534_v11 = vmul.f32 0.8187308, %v496_v57 }
  0xd3   : > { %460 = vrot.lane.b32.xlu0 %v980_v58, %s1051_s10  ;;  %vm507_vm12 = vmand %vm506_vm11, %vm374_vm3 }
  0xd4   : > { %v889_v59 = vsel %vm507_vm12, 1.0, %v1050_v23 }
  0xd5   : > { %891 = vmatmul.msk.f32.vlgmr.msrb.gmra.mxu1 %vm382_vm8, %v889_v59  ;;  %v351_v32 = vpop.f32.mrf.mxu0 }
  0xd6   : > { %v352_v33 = vadd.f32 %v1294_v37, %v351_v32 }
  0xd8   : > { %v982_v60 = vpop.eup %981 }
  0xd9   : > { %501 = vrot.lane.b32.xlu1 %v982_v60, %s1051_s10 }
  0xdd   : > { %v354_v35 = vpop.f32.mrf.mxu0 }
  0xde   : > { %v355_v40 = vadd.f32 %v1294_v37, %v354_v35 }
  0xe5   : > { %v357_v58 = vpop.f32.mrf.mxu0 }
  0xed   : > { %v360_v1 = vpop.f32.mrf.mxu0 }
  0xee   : > { %v361_v4 = vadd.f32 %v1294_v37, %v360_v1 }
 0x145   : > { %v461_v63 = vpop.permute.xlu0 %460 }
 0x146   : > { %884 = vst.msk [vmem:[%s1147_s27 + $0x8] sm:$0xff] %vm422_vm13, %v461_v63 }
 0x14b   : > { %v502_v2 = vpop.permute.xlu1 %501 }
 0x14c   : > { %888 = vst.msk [vmem:[%s1147_s27 + $0x10] sm:$0xff] %vm422_vm13, %v502_v2 }
 0x152   : > { %v489_v5 = vpop.f32.mrf.mxu3  ;;  %v530_v9 = vpop.f32.mrf.mxu1 }
 0x153   : > { %v492_v7 = vadd.f32 %v489_v5, %v346_v3  ;;  %v533_v13 = vadd.f32 %v530_v9, %v349_v6 }
 0x155   : > { %v498_v10 = vadd.f32 %v497_v8, %v492_v7 }
 0x157   : > { %v535_v12 = vmul.f32 0.18126924, %v498_v10  ;;  %v538_v14 = vmul.f32 0.60653067, %v498_v10 }
 0x159   : > { %v536_v16 = vadd.f32 %v535_v12, %v534_v11  ;;  %v539_v17 = vadd.f32 %v538_v14, %v533_v13  ;;  %v769_v11 = vld [vmem:[%s1147_s27 + $0x8] sm:$0xff] (%p1125_p6)  ;;  %v771_v12 = vld [vmem:[%s1147_s27 + $0x10] sm:$0xff] (%p1125_p6) }
 0x15a   : > { %770 = vst [vmem:[%s724_s26 + $0x10] sm:$0xff] (%p1125_p6), %v769_v11 }
 0x15b   : > { %v537_v18 = vsub.f32 %v536_v16, %v889_v59  ;;  %v576_v19 = vmul.f32 0.18126924, %v539_v17  ;;  %v579_v38 = vmul.f32 0.60653067, %v539_v17  ;;  %v358_v59 = vadd.f32 %v1294_v37, %v357_v58  ;;  %v767_v37 = vld [vmem:[%s1147_s27] sm:$0xff] (%p1125_p6)  ;;  %772 = vst [vmem:[%s724_s26 + $0x20] sm:$0xff] (%p1125_p6), %v771_v12 }
 0x15c   : > { %768 = vst [vmem:[%s724_s26] sm:$0xff] (%p1125_p6), %v767_v37 }
 0x15d   : > { %983 = vtanh.f32 %v537_v18  ;;  %vm547_vm14 = vcmp.gt.f32.partialorder %v537_v18, 1.0  ;;  %v575_v20 = vmul.f32 0.8187308, %v537_v18 }
 0x15e   : > { %vm548_vm15 = vmand %vm547_vm14, %vm374_vm3 }
 0x15f   : > { %v893_v21 = vsel %vm548_vm15, 1.0, %v1050_v23  ;;  %v577_v22 = vadd.f32 %v576_v19, %v575_v20 }
 0x160   : > { %895 = vmatmul.msk.f32.vlgmr.msrb.gmra.mxu2 %vm382_vm8, %v893_v21 }
 0x161   : > { %v578_v24 = vsub.f32 %v577_v22, %v893_v21 }
 0x163   : > { %v984_v25 = vpop.eup %983  ;;  %vm588_vm0 = vcmp.gt.f32.partialorder %v578_v24, 1.0  ;;  %985 = vtanh.f32 %v578_v24  ;;  %v616_v41 = vmul.f32 0.8187308, %v578_v24 }
 0x164   : > { %542 = vrot.lane.b32.xlu1 %v984_v25, %s1051_s10  ;;  %vm589_vm1 = vmand %vm588_vm0, %vm374_vm3 }
 0x165   : > { %v897_v26 = vsel %vm589_vm1, 1.0, %v1050_v23 }
 0x166   : > { %899 = vmatmul.msk.f32.vlgmr.msrb.gmra.mxu3 %vm382_vm8, %v897_v26 }
 0x169   : > { %v986_v27 = vpop.eup %985 }
 0x16a   : > { %583 = vrot.lane.b32.xlu2 %v986_v27, %s1051_s10 }
 0x1c4   : > { %v584_v28 = vpop.permute.xlu2 %583 }
 0x1c5   : > { %896 = vst.msk [vmem:[%s1147_s27 + $0x20] sm:$0xff] %vm422_vm13, %v584_v28 }
 0x1cc   : > { %v775_v14 = vld [vmem:[%s1147_s27 + $0x20] sm:$0xff] (%p1125_p6) }
 0x1cd   : > { %776 = vst [vmem:[%s724_s26 + $0x40] sm:$0xff] (%p1125_p6), %v775_v14 }
 0x1d6   : > { %v543_v30 = vpop.permute.xlu1 %542 }
 0x1d7   : > { %892 = vst.msk [vmem:[%s1147_s27 + $0x18] sm:$0xff] %vm422_vm13, %v543_v30 }
 0x1de   : > { %v773_v13 = vld [vmem:[%s1147_s27 + $0x18] sm:$0xff] (%p1125_p6) }
 0x1df   : > { %774 = vst [vmem:[%s724_s26 + $0x30] sm:$0xff] (%p1125_p6), %v773_v13 }
 0x1e3   : > { %v571_v34 = vpop.f32.mrf.mxu2 }
 0x1e4   : > { %v574_v36 = vadd.f32 %v571_v34, %v352_v33 }
 0x1e6   : > { %v580_v39 = vadd.f32 %v579_v38, %v574_v36 }
 0x1e8   : > { %v617_v42 = vmul.f32 0.18126924, %v580_v39  ;;  %v620_v46 = vmul.f32 0.60653067, %v580_v39 }
 0x1e9   : > { %v612_v43 = vpop.f32.mrf.mxu3 }
 0x1ea   : > { %v618_v44 = vadd.f32 %v617_v42, %v616_v41  ;;  %v615_v45 = vadd.f32 %v612_v43, %v355_v40 }
 0x1ec   : > { %v619_v47 = vsub.f32 %v618_v44, %v897_v26  ;;  %v621_v48 = vadd.f32 %v620_v46, %v615_v45 }
 0x1ee   : > { %987 = vtanh.f32 %v619_v47  ;;  %v657_v49 = vmul.f32 0.8187308, %v619_v47  ;;  %v658_v50 = vmul.f32 0.18126924, %v621_v48  ;;  %vm629_vm2 = vcmp.gt.f32.partialorder %v619_v47, 1.0 }
 0x1ef   : > { %vm630_vm4 = vmand %vm629_vm2, %vm374_vm3  ;;  %v661_v15 = vmul.f32 0.60653067, %v621_v48 }
 0x1f0   : > { %v659_v51 = vadd.f32 %v658_v50, %v657_v49  ;;  %v901_v52 = vsel %vm630_vm4, 1.0, %v1050_v23 }
 0x1f1   : > { %903 = vmatmul.msk.f32.vlgmr.msra.gmra.mxu1 %vm382_vm8, %v901_v52 }
 0x1f2   : > { %v660_v53 = vsub.f32 %v659_v51, %v901_v52 }
 0x1f4   : > { %v988_v54 = vpop.eup %987  ;;  %989 = vtanh.f32 %v660_v53  ;;  %vm670_vm5 = vcmp.gt.f32.partialorder %v660_v53, 1.0  ;;  %v698_v0 = vmul.f32 0.8187308, %v660_v53 }
 0x1f5   : > { %624 = vrot.lane.b32.xlu2 %v988_v54, %s1051_s10  ;;  %vm671_vm6 = vmand %vm670_vm5, %vm374_vm3 }
 0x1f6   : > { %v905_v55 = vsel %vm671_vm6, 1.0, %v1050_v23 }
 0x1f7   : > { %907 = vmatmul.msk.f32.vlgmr.msra.gmra.mxu2 %vm382_vm8, %v905_v55 }
 0x1fa   : > { %v990_v56 = vpop.eup %989 }
 0x1fb   : > { %665 = vrot.lane.b32.xlu0 %v990_v56, %s1051_s10 }
 0x24f   : > { %v625_v57 = vpop.permute.xlu2 %624 }
 0x250   : > { %900 = vst.msk [vmem:[%s1147_s27 + $0x28] sm:$0xff] %vm422_vm13, %v625_v57 }
 0x257   : > { %v777_v16 = vld [vmem:[%s1147_s27 + $0x28] sm:$0xff] (%p1125_p6) }
 0x258   : > { %778 = vst [vmem:[%s724_s26 + $0x50] sm:$0xff] (%p1125_p6), %v777_v16 }
 0x26d   : > { %v666_v60 = vpop.permute.xlu0 %665 }
 0x26e   : > { %904 = vst.msk [vmem:[%s1147_s27 + $0x30] sm:$0xff] %vm422_vm13, %v666_v60  ;;  %v653_v61 = vpop.f32.mrf.mxu1 }
 0x26f   : > { %v656_v62 = vadd.f32 %v653_v61, %v358_v59 }
 0x271   : > { %v662_v63 = vadd.f32 %v661_v15, %v656_v62 }
 0x273   : > { %v699_v23 = vmul.f32 0.18126924, %v662_v63  ;;  %v702_v7 = vmul.f32 0.60653067, %v662_v63 }
 0x275   : > { %v700_v2 = vadd.f32 %v699_v23, %v698_v0  ;;  %v779_v17 = vld [vmem:[%s1147_s27 + $0x30] sm:$0xff] (%p1125_p6) }
 0x276   : > { %780 = vst [vmem:[%s724_s26 + $0x60] sm:$0xff] (%p1125_p6), %v779_v17 }
 0x277   : > { %v701_v3 = vsub.f32 %v700_v2, %v905_v55 }
 0x279   : > { %991 = vtanh.f32 %v701_v3  ;;  %712 = vst.msk [vmem:[#allocation2 + $0x8] sm:$0xff] %vm382_vm8, %v701_v3 }
 0x27a   : > { %v694_v5 = vpop.f32.mrf.mxu2 }
 0x27b   : > { %v697_v6 = vadd.f32 %v694_v5, %v361_v4 }
 0x27d   : > { %v703_v8 = vadd.f32 %v702_v7, %v697_v6 }
 0x27f   : > { %v992_v9 = vpop.eup %991  ;;  %711 = vst.msk [vmem:[#allocation2] sm:$0xff] %vm382_vm8, %v703_v8 }
 0x280   : > { %706 = vrot.lane.b32.xlu1 %v992_v9, %s1051_s10 }
 0x2ef   : > { %719 = sbr.rel (!%p1125_p6) target bundleno = 764 (0x2fc), region = 82 }
 0x2f2   : > { %v707_v10 = vpop.permute.xlu1 %706 }
 0x2f3   : > { %908 = vst.msk [vmem:[%s1147_s27 + $0x38] sm:$0xff] %vm422_vm13, %v707_v10 }
 0x2fa   : > { %v781_v18 = vld [vmem:[%s1147_s27 + $0x38] sm:$0xff] }
 0x2fb   : > { %782 = vst [vmem:[%s724_s26 + $0x70] sm:$0xff] %v781_v18 }
 0x2fc PF: > { %s14_s21 = sadd.s32 1, %s1047_s21   ;;  %s1406_s15 = smov %s1027_s16 }
 0x2fd   : > { %p11_p13 = scmp.ge.s32.totalorder %s14_s21, 10   ;;  %s1407_s16 = smov %s1133_s30 }
 0x2fe   : > { %s1408_s17 = smov %s1039_s19  ;;  %s1409_s18 = smov %s1043_s20 }
 0x2ff   : > { %s1410_s19 = smov %s1413_s22  ;;  %s1411_s20 = smov %s1417_s23 }
 0x300   :  { %13 = sbr.rel (!%p11_p13) target bundleno = 4 (0x4), region = 159 }

</bundles_post_ra>
